<compile_context>
chip_gen: v5e
topology: v5e:2x2
jax: 0.10.0
libtpu: 0.0.40
codegen_flags: <defaults>
</compile_context>

<pallas_src>
import functools

import jax
import jax.numpy as jnp
from jax.experimental import pallas as pl
from jax.experimental.pallas import tpu as pltpu

LANES = 128
DEFAULT_BLOCK_ROWS = 4096  # 2 MiB f32 per stream per buffer; fine on all gens
                           # with the explicit vmem_limit_bytes below.


def _round_up(x, m):
    return ((x + m - 1) // m) * m


def _detect_num_tensorcores():
    """Best-effort TensorCores-per-chip (2 on v7x/megacore, else 1). Never raises."""
    try:
        info = pltpu.get_tpu_info()
        for attr in ("num_cores", "core_count", "num_tensorcores",
                     "tensorcore_count", "cores_per_chip"):
            v = getattr(info, attr, None)
            if isinstance(v, int) and v > 0:
                return min(int(v), 2)
    except Exception:
        pass
    try:
        v = getattr(jax.devices()[0], "num_cores", None)
        if isinstance(v, int) and v > 0:
            return min(int(v), 2)
    except Exception:
        pass
    return 1


def _inpainting_loss_kernel(pred_ref, target_ref, mask_ref, out_ref, *,
                            alpha, rows, block_rows, steps_per_core,
                            num_full_blocks, has_tail):
    i = pl.program_id(1)  # reduction ("arbitrary") axis

    @pl.when(i == 0)
    def _init():
        out_ref[...] = jnp.zeros_like(out_ref)

    diff = jnp.abs(pred_ref[...].astype(jnp.float32)
                   - target_ref[...].astype(jnp.float32))
    # Fused weighting: |d| * (alpha*mask + (1-alpha)); mask cast in-kernel so
    # low-precision masks save HBM bytes.
    w = (jnp.float32(alpha) * mask_ref[...].astype(jnp.float32)
         + jnp.float32(1.0 - alpha))
    contrib = diff * w

    def accumulate(x):
        # Fold block rows into the resident (8, LANES) partial-sum tile (VPU only).
        # NOTE: plain f32 accumulation; per-lane spreading keeps error small.
        # TODO(synk): compensated sum if tensors reach hundreds of millions of elems.
        out_ref[...] += x.reshape(-1, 8, LANES).sum(axis=0)

    if not has_tail:
        # Hot path: no row mask anywhere in the grid.
        accumulate(contrib)
    else:
        c = pl.program_id(0)
        global_block = c * steps_per_core + i

        @pl.when(global_block < num_full_blocks)
        def _full():  # full blocks: mask stays off the hot path
            accumulate(contrib)

        @pl.when(global_block >= num_full_blocks)
        def _tail():  # ragged / overrun blocks only
            row_ids = (global_block * block_rows
                       + jax.lax.broadcasted_iota(jnp.int32, contrib.shape, 0))
            accumulate(jnp.where(row_ids < rows, contrib, 0.0))


def inpainting_loss(pred, target, mask, alpha=0.7,
                    block_rows=DEFAULT_BLOCK_ROWS, num_cores=None,
                    buffer_count=2):
    """alpha * mean(|pred-target| * mask) + (1-alpha) * mean(|pred-target|)."""
    assert pred.shape == target.shape == mask.shape
    numel = pred.size  # the mean is over the ORIGINAL element count

    def as_slab(x):
        flat = x.reshape(-1)
        if numel % LANES != 0:
            # Rare fallback: pad to a full lane row (pads contribute |0-0| == 0).
            flat = jnp.pad(flat, (0, LANES - numel % LANES))
        return flat.reshape(-1, LANES)  # free reshape (no copy) on the main path

    pred2d, target2d, mask2d = as_slab(pred), as_slab(target), as_slab(mask)
    rows = pred2d.shape[0]

    # Tile height: aligned to the sublane packing of the narrowest input dtype
    # (8 for f32, 16 for bf16, 32 for int8), capped near the row count.
    min_itemsize = min(jnp.dtype(x.dtype).itemsize
                       for x in (pred2d, target2d, mask2d))
    row_align = {4: 8, 2: 16, 1: 32}.get(int(min_itemsize), 8)
    block_rows = _round_up(max(1, min(int(block_rows), rows)), row_align)

    # Split the row blocks across the chip's TensorCores (v7x: 2, else 1).
    num_blocks = (rows + block_rows - 1) // block_rows
    if num_cores is None:
        num_cores = _detect_num_tensorcores()
    num_cores = max(1, min(int(num_cores), num_blocks))
    steps_per_core = (num_blocks + num_cores - 1) // num_cores
    padded_blocks = num_cores * steps_per_core
    num_full_blocks = rows // block_rows
    has_tail = padded_blocks != num_full_blocks  # some block overruns `rows`

    if padded_blocks > num_blocks:
        # Some (core, step) pairs fall past the last real block: clamp the DMA
        # to the last block; the in-kernel row mask zeroes their contribution.
        def in_map(c, i):
            return (jnp.minimum(c * steps_per_core + i, num_blocks - 1), 0)
    else:
        def in_map(c, i):
            return (c * steps_per_core + i, 0)

    spec_kwargs = {}
    if buffer_count != 2:
        # v7x: worth sweeping pipeline depth 3 to hide DMA-issue latency.
        spec_kwargs["pipeline_mode"] = pl.Buffered(int(buffer_count))
    tile_spec = pl.BlockSpec((block_rows, LANES), in_map, **spec_kwargs)
    out_spec = pl.BlockSpec((None, 8, LANES), lambda c, i: (c, 0, 0))

    kernel = functools.partial(
        _inpainting_loss_kernel,
        alpha=float(alpha),
        rows=rows,
        block_rows=block_rows,
        steps_per_core=steps_per_core,
        num_full_blocks=num_full_blocks,
        has_tail=has_tail,
    )

    # Explicit VMEM budget: 3 streams x buffer_count tiles + headroom, so tall
    # tiles also clear v5e's 16 MiB scoped-VMEM default (and stay < 64 MiB v7x).
    bytes_per_tile_set = sum(
        block_rows * LANES * jnp.dtype(x.dtype).itemsize
        for x in (pred2d, target2d, mask2d))
    vmem_limit = int(buffer_count) * int(bytes_per_tile_set) + (4 << 20)
    vmem_limit = max(16 << 20, min(vmem_limit, 64 << 20))

    in_bytes = int(pred2d.nbytes + target2d.nbytes + mask2d.nbytes)
    out_bytes = num_cores * 8 * LANES * 4
    cost = pl.CostEstimate(flops=5 * int(numel), transcendentals=0,
                           bytes_accessed=in_bytes + out_bytes)

    partials = pl.pallas_call(
        kernel,
        out_shape=jax.ShapeDtypeStruct((num_cores, 8, LANES), jnp.float32),
        grid_spec=pltpu.PrefetchScalarGridSpec(
            num_scalar_prefetch=0,
            grid=(num_cores, steps_per_core),
            in_specs=[tile_spec, tile_spec, tile_spec],
            out_specs=out_spec,
        ),
        compiler_params=pltpu.CompilerParams(
            dimension_semantics=("parallel", "arbitrary"),
            vmem_limit_bytes=vmem_limit),
        cost_estimate=cost,
    )(pred2d, target2d, mask2d)

    # Final tiny cross-lane / cross-core reduce (num_cores * 1024 f32) in XLA.
    return jnp.sum(partials) * jnp.float32(1.0 / numel)


if __name__ == "__main__":
    key = jax.random.PRNGKey(0)
    k1, k2, k3 = jax.random.split(key, 3)

    def ref_loss(p, t, m, alpha=0.7):
        diff = jnp.abs(p - t)
        return (alpha * jnp.mean(diff * m.astype(p.dtype))
                + (1.0 - alpha) * jnp.mean(diff))

    # Small NCHW shapes consistent with an image-inpainting setting.
    N, C, H, W = 2, 4, 16, 16
    pred = jax.random.normal(k1, (N, C, H, W), dtype=jnp.float32)
    target = jax.random.normal(k2, (N, C, H, W), dtype=jnp.float32)
    mask = (jax.random.uniform(k3, (N, C, H, W)) > 0.5).astype(jnp.float32)

    # 1) Default configuration (auto tile height / auto core count).
    loss = jax.block_until_ready(inpainting_loss(pred, target, mask, alpha=0.7))
    ref = ref_loss(pred, target, mask, alpha=0.7)
    assert jnp.allclose(loss, ref, rtol=1e-5, atol=1e-6), (loss, ref)

    # 2) Multi-step reduction + explicit 2-way core split (valid on any chip:
    #    the parallel core axis simply serializes on 1-TC generations).
    loss2 = jax.block_until_ready(
        inpainting_loss(pred, target, mask, alpha=0.7, block_rows=8, num_cores=2))
    assert jnp.allclose(loss2, ref, rtol=1e-5, atol=1e-6), (loss2, ref)

    # 3) Ragged shape (wrapper pad + in-kernel tail mask) with a bf16 mask
    #    (exercises the reduced-HBM-traffic mask path).
    shp = (1, 3, 11, 13)
    p3 = jax.random.normal(k1, shp, dtype=jnp.float32)
    t3 = jax.random.normal(k2, shp, dtype=jnp.float32)
    m3 = (jax.random.uniform(k3, shp) > 0.5).astype(jnp.bfloat16)
    loss3 = jax.block_until_ready(inpainting_loss(p3, t3, m3, alpha=0.25))
    ref3 = ref_loss(p3, t3, m3, alpha=0.25)
    assert jnp.allclose(loss3, ref3, rtol=1e-5, atol=1e-6), (loss3, ref3)

    print("KERNEL_OK")
</pallas_src>

<mosaic_0001>
module attributes {stable_mosaic.version = 11 : i64} {
  func.func @_inpainting_loss_kernel(%arg0: i32, %arg1: i32, %arg2: memref<16x128xf32, #tpu.memory_space<vmem>>, %arg3: memref<16x128xf32, #tpu.memory_space<vmem>>, %arg4: memref<16x128xf32, #tpu.memory_space<vmem>>, %arg5: memref<1x8x128xf32, #tpu.memory_space<vmem>>) attributes {dimension_semantics = [#tpu.dimension_semantics<parallel>, #tpu.dimension_semantics<arbitrary>], iteration_bounds = array<i64: 1, 1>, scalar_prefetch = 0 : i64, scratch_operands = 0 : i64, tpu.core_type = #tpu.core_type<tc>, window_params = [{transform_indices = @transform_0, window_bounds = array<i64: 16, 128>}, {transform_indices = @transform_1, window_bounds = array<i64: 16, 128>}, {transform_indices = @transform_2, window_bounds = array<i64: 16, 128>}, {transform_indices = @transform_3, window_bounds = array<i64: 1, 8, 128>}]} {
    %c0_i32 = arith.constant 0 : i32
    %0 = arith.cmpi eq, %arg1, %c0_i32 : i32
    %1 = arith.extui %0 : i1 to i32
    %c0_i32_0 = arith.constant 0 : i32
    %2 = arith.cmpi ne, %1, %c0_i32_0 : i32
    scf.if %2 {
      %cst_14 = arith.constant 0.000000e+00 : f32
      %21 = vector.broadcast %cst_14 : f32 to vector<8x128xf32>
      %c0_15 = arith.constant 0 : index
      %c0_16 = arith.constant 0 : index
      %c0_17 = arith.constant 0 : index
      %22 = vector.load %arg5[%c0_15, %c0_16, %c0_17] : memref<1x8x128xf32, #tpu.memory_space<vmem>>, vector<1x8x128xf32>
      %23 = vector.shape_cast %22 : vector<1x8x128xf32> to vector<8x128xf32>
      %24 = vector.shape_cast %21 : vector<8x128xf32> to vector<1x8x128xf32>
      tpu.vector_store %arg5[%c0_15, %c0_16, %c0_17], %24 {strides = array<i32>} : memref<1x8x128xf32, #tpu.memory_space<vmem>>, vector<1x8x128xf32>,
    } else {
    }
    %c0 = arith.constant 0 : index
    %c0_1 = arith.constant 0 : index
    %3 = vector.load %arg2[%c0, %c0_1] : memref<16x128xf32, #tpu.memory_space<vmem>>, vector<16x128xf32>
    %c0_2 = arith.constant 0 : index
    %c0_3 = arith.constant 0 : index
    %4 = vector.load %arg3[%c0_2, %c0_3] : memref<16x128xf32, #tpu.memory_space<vmem>>, vector<16x128xf32>
    %5 = arith.subf %3, %4 : vector<16x128xf32>
    %6 = math.absf %5 : vector<16x128xf32>
    %c0_4 = arith.constant 0 : index
    %c0_5 = arith.constant 0 : index
    %7 = vector.load %arg4[%c0_4, %c0_5] : memref<16x128xf32, #tpu.memory_space<vmem>>, vector<16x128xf32>
    %cst = arith.constant 0.699999988 : f32
    %8 = vector.broadcast %cst : f32 to vector<16x128xf32>
    %9 = arith.mulf %8, %7 : vector<16x128xf32>
    %cst_6 = arith.constant 3.000000e-01 : f32
    %10 = vector.broadcast %cst_6 : f32 to vector<16x128xf32>
    %11 = arith.addf %9, %10 : vector<16x128xf32>
    %12 = arith.mulf %6, %11 : vector<16x128xf32>
    %c0_7 = arith.constant 0 : index
    %c0_8 = arith.constant 0 : index
    %c0_9 = arith.constant 0 : index
    %13 = vector.load %arg5[%c0_7, %c0_8, %c0_9] : memref<1x8x128xf32, #tpu.memory_space<vmem>>, vector<1x8x128xf32>
    %14 = vector.shape_cast %13 : vector<1x8x128xf32> to vector<8x128xf32>
    %15 = vector.shape_cast %12 : vector<16x128xf32> to vector<2x8x128xf32>
    %cst_10 = arith.constant dense<0.000000e+00> : vector<8x128xf32>
    %16 = vector.multi_reduction <add>, %15, %cst_10 [0] : vector<2x8x128xf32> to vector<8x128xf32>
    %17 = arith.addf %14, %16 : vector<8x128xf32>
    %c0_11 = arith.constant 0 : index
    %c0_12 = arith.constant 0 : index
    %c0_13 = arith.constant 0 : index
    %18 = vector.load %arg5[%c0_11, %c0_12, %c0_13] : memref<1x8x128xf32, #tpu.memory_space<vmem>>, vector<1x8x128xf32>
    %19 = vector.shape_cast %18 : vector<1x8x128xf32> to vector<8x128xf32>
    %20 = vector.shape_cast %17 : vector<8x128xf32> to vector<1x8x128xf32>
    tpu.vector_store %arg5[%c0_11, %c0_12, %c0_13], %20 {strides = array<i32>} : memref<1x8x128xf32, #tpu.memory_space<vmem>>, vector<1x8x128xf32>,
    return
  }
  func.func @transform_0(%arg0: i32, %arg1: i32) -> (i32, i32) {
    %c1_i32 = arith.constant 1 : i32
    %0 = arith.muli %arg0, %c1_i32 : i32
    %1 = arith.addi %0, %arg1 : i32
    %c0_i32 = arith.constant 0 : i32
    %c0_i32_0 = arith.constant 0 : i32
    return %1, %c0_i32 : i32, i32
  }
  func.func @transform_1(%arg0: i32, %arg1: i32) -> (i32, i32) {
    %c1_i32 = arith.constant 1 : i32
    %0 = arith.muli %arg0, %c1_i32 : i32
    %1 = arith.addi %0, %arg1 : i32
    %c0_i32 = arith.constant 0 : i32
    %c0_i32_0 = arith.constant 0 : i32
    return %1, %c0_i32 : i32, i32
  }
  func.func @transform_2(%arg0: i32, %arg1: i32) -> (i32, i32) {
    %c1_i32 = arith.constant 1 : i32
    %0 = arith.muli %arg0, %c1_i32 : i32
    %1 = arith.addi %0, %arg1 : i32
    %c0_i32 = arith.constant 0 : i32
    %c0_i32_0 = arith.constant 0 : i32
    return %1, %c0_i32 : i32, i32
  }
  func.func @transform_3(%arg0: i32, %arg1: i32) -> (i32, i32, i32) {
    %c0_i32 = arith.constant 0 : i32
    %c0_i32_0 = arith.constant 0 : i32
    %c0_i32_1 = arith.constant 0 : i32
    return %arg0, %c0_i32, %c0_i32_0 : i32, i32, i32
  }
}

</mosaic_0001>

<bundles_post_ra>
// kernel: tpu_custom_call.1
= control target key start
LH: loop header
LB: loop body
LE: loop exit
PB: predicated region body
PF: predicated region fallthrough
CT: control target
= control target key end

     0   :  { %8 = vsyncpa [#allocation3], 0  ;;  %s270_s0 = inlined_call_operand.hbm [shape: f32[16,128], index: 0, kind: input, shape index: {}]   ;;  %s271_s1 = inlined_call_operand.hbm [shape: f32[16,128], index: 1, kind: input, shape index: {}]   ;;  %s272_s2 = inlined_call_operand.hbm [shape: f32[16,128], index: 2, kind: input, shape index: {}]   ;;  %s273_s3 = inlined_call_operand.hbm [shape: f32[1,8,128], index: 3, kind: output, shape index: {}]  }
   0x1   :  { %9 = vsyncpa [#allocation6], 0 }
   0x2   :  { %10 = vsyncpa [#allocation4], 0  ;;  %s36_s14 = sshll.u32 %s271_s1, 4  ;;  %s232_s15 = smov [#allocation5]   ;;  %s37_s14 = int_to_ptr.hbm [resolvable:$true] %s36_s14 }
   0x3   :  { %s38_s16 = sshll.u32 %s232_s15, 4  ;;  %s19_s19 = sshll.u32 %s270_s0, 4  ;;  %s39_s16 = int_to_ptr.vmem [resolvable:$true] %s38_s16  ;;  %s20_s19 = int_to_ptr.hbm [resolvable:$true] %s19_s19 }
   0x4   :  { %s233_s20 = smov 128   ;;  %s234_s21 = smov 8  }
   0x5   :  { %44 = dma.hbm_to_vmem [thread:$0]  %s37_s14, 256, %s39_s16, [#allocation6], %s233_s20, %s233_s20, %s234_s21  }
   0x6   :  { %s235_s22 = smov [#allocation2]   ;;  %s53_s26 = sshll.u32 %s272_s2, 4  ;;  %s54_s26 = int_to_ptr.hbm [resolvable:$true] %s53_s26 }
   0x7   :  { %s21_s23 = sshll.u32 %s235_s22, 4  ;;  %s236_s1 = smov [#allocation7]   ;;  %s22_s23 = int_to_ptr.vmem [resolvable:$true] %s21_s23 }
   0x8   :  { %27 = dma.hbm_to_vmem [thread:$0]  %s20_s19, 256, %s22_s23, [#allocation3], %s233_s20, %s233_s20, %s234_s21  }
   0x9   :  { %s55_s27 = sshll.u32 %s236_s1, 4  ;;  %s56_s27 = int_to_ptr.vmem [resolvable:$true] %s55_s27 }
   0xa   :  { %61 = dma.hbm_to_vmem [thread:$0]  %s54_s26, 256, %s56_s27, [#allocation6], %s233_s20, %s233_s20, %s234_s21  }
   0xb   :  { %226 = dma.done.wait [#allocation3], 256  }
   0xc   :  { %227 = vsyncadd [#allocation3], 4294967040 }
   0xd   :  { %228 = dma.done.wait [#allocation6], 512  }
   0xe   :  { %229 = vsyncadd [#allocation6], 4294966784  ;;  %v85_v0 = vld [vmem:[#allocation2] sm:$0xff]  ;;  %v86_v1 = vld [vmem:[#allocation2 + $0x8] sm:$0xff]  ;;  %s237_s0 = smov [#allocation8]   ;;  %s112_s30 = sshll.u32 %s273_s3, 4  ;;  %s113_s30 = int_to_ptr.hbm [resolvable:$true] %s112_s30 }
   0xf   :  { %v87_v2 = vld [vmem:[#allocation5] sm:$0xff]  ;;  %v88_v3 = vld [vmem:[#allocation5 + $0x8] sm:$0xff]  ;;  %v93_v5 = vld [vmem:[#allocation7] sm:$0xff]  ;;  %s110_s2 = sshll.u32 %s237_s0, 4  ;;  %s111_s2 = int_to_ptr.vmem [resolvable:$true] %s110_s2 }
  0x10   :  { %v89_v4 = vsub.f32 %v85_v0, %v87_v2  ;;  %v94_v6 = vld [vmem:[#allocation7 + $0x8] sm:$0xff]  ;;  %v90_v7 = vsub.f32 %v86_v1, %v88_v3  ;;  %v95_v8 = vmul.f32 0.7, %v93_v5 }
  0x11   :  { %v96_v9 = vmul.f32 0.7, %v94_v6 }
  0x12   :  { %v91_v10 = vand.u32 2147483647, %v89_v4  ;;  %v92_v11 = vand.u32 2147483647, %v90_v7  ;;  %v97_v12 = vadd.f32 0.3, %v95_v8 }
  0x13   :  { %v98_v13 = vadd.f32 0.3, %v96_v9 }
  0x14   :  { %v99_v14 = vmul.f32 %v97_v12, %v91_v10 }
  0x15   :  { %v100_v15 = vmul.f32 %v98_v13, %v92_v11 }
  0x17   :  { %v102_v16 = vadd.f32 %v100_v15, %v99_v14 }
  0x19   :  { %104 = vst [vmem:[#allocation8] sm:$0xff] %v102_v16 }
  0x1a   :  { %115 = dma.vmem_to_hbm [thread:$0]  %s111_s2, 128, %s113_s30, [#allocation4]  }
  0x1b   :  { %230 = dma.done.wait [#allocation4], 128  }
  0x1c   :  { %231 = vsyncadd [#allocation4], 4294967168 }
  0x1d   :  { %120 = vsyncpa [#allocation3], 1 }
  0x1e   :  { %121 = vsyncpa [#allocation6], 1 }
  0x1f   :  { %122 = vsyncpa [#allocation4], 1 }

</bundles_post_ra>
